<compile_context>
chip_gen: v7x
topology: tpu7x:2x2x1
jax: 0.10.0
libtpu: 0.0.40
codegen_flags: <defaults>
</compile_context>

<pallas_src>
import functools

import jax
import jax.numpy as jnp
from jax.experimental import pallas as pl
from jax.experimental.pallas import tpu as pltpu


_VMEM_LIMIT_BYTES = 48 * 1024 * 1024   # above 16/32 MiB defaults, below all physical limits


def _round_up(x, m):
    return ((x + m - 1) // m) * m


# ---------------------------------------------------------------------------
# Tiled dense projection: Y = X @ W + b, grid over (M tiles, N tiles, K tiles)
# with an f32 VMEM accumulator.  Operands are zero-padded up to tile multiples
# in the wrapper (zero K-padding contributes nothing to the dot).
# ---------------------------------------------------------------------------
def _dense_kernel(x_ref, w_ref, b_ref, o_ref, acc_ref):
    @pl.when(pl.program_id(2) == 0)
    def _():
        acc_ref[...] = jnp.zeros_like(acc_ref)

    acc_ref[...] += jnp.dot(x_ref[...], w_ref[...],
                            preferred_element_type=jnp.float32)

    @pl.when(pl.program_id(2) == pl.num_programs(2) - 1)
    def _():
        o_ref[...] = (acc_ref[...] + b_ref[...]).astype(o_ref.dtype)


def _dense(x, w, b, out_dtype, *, tm=256, tn=256, tk=512):
    M, Kd = x.shape
    N = w.shape[1]
    tm = min(tm, _round_up(M, 8))
    tn = min(tn, _round_up(N, 128))
    tk = min(tk, _round_up(Kd, 128))
    Mp, Np, Kp = _round_up(M, tm), _round_up(N, tn), _round_up(Kd, tk)

    xp = jnp.pad(x, ((0, Mp - M), (0, Kp - Kd)))
    wp = jnp.pad(w, ((0, Kp - Kd), (0, Np - N)))
    bp = jnp.pad(b.astype(jnp.float32), ((0, 0), (0, Np - N)))

    out = pl.pallas_call(
        _dense_kernel,
        grid_spec=pltpu.PrefetchScalarGridSpec(
            num_scalar_prefetch=0,
            grid=(Mp // tm, Np // tn, Kp // tk),
            in_specs=[
                pl.BlockSpec((tm, tk), lambda i, j, k: (i, k)),
                pl.BlockSpec((tk, tn), lambda i, j, k: (k, j)),
                pl.BlockSpec((1, tn), lambda i, j, k: (0, j)),
            ],
            out_specs=pl.BlockSpec((tm, tn), lambda i, j, k: (i, j)),
            scratch_shapes=[pltpu.VMEM((tm, tn), jnp.float32)],
        ),
        out_shape=jax.ShapeDtypeStruct((Mp, Np), out_dtype),
        compiler_params=pltpu.CompilerParams(
            dimension_semantics=("parallel", "parallel", "arbitrary"),
            vmem_limit_bytes=_VMEM_LIMIT_BYTES),
    )(xp, wp, bp)
    return out[:M, :N]


# ---------------------------------------------------------------------------
# Recurrent core: one grid step == `time_chunk` time steps.  Recurrent state
# (h, c, d, running sum) is register-carried across the unrolled chunk; the
# constant-index output refs are written once per chunk.
# ---------------------------------------------------------------------------
def _mlstm_recurrent_kernel(g_ref, h0_ref, c0_ref, d0_ref, wh_ref,
                            hseq_ref, h_ref, c_ref, d_ref,
                            *, K, time_chunk, total_steps):
    chunk = pl.program_id(1)
    Tc = time_chunk
    H = h0_ref.shape[-1]

    # Initialize recurrent state on the first chunk of this batch block.
    @pl.when(chunk == 0)
    def _():
        h_ref[...] = h0_ref[...]
        c_ref[...] = c0_ref[...]
        d_ref[...] = d0_ref[...]

    # Register-carried state for the whole chunk (no per-step VMEM round-trips
    # for h / c / d / running sum).
    h = h_ref[...]                                  # [B, H] f32
    c = c_ref[...]                                  # [B, H] f32
    d = [d_ref[k] for k in range(K)]                # K x [B, H] f32
    # Re-derive the ring-buffer running sum every chunk boundary: bounds the
    # FP drift of the incremental update to one chunk's worth.
    s_sum = d[0]
    for k in range(1, K):
        s_sum = s_sum + d[k]

    wh = wh_ref[...]                                # hoisted out of the s-loop
    mxu_dtype = wh.dtype
    inv_K = jnp.float32(1.0 / K)

    # Static unroll over the time chunk (Tc is a small Python int, a multiple
    # of K so `slot` below is a compile-time constant per step).
    # TODO(synk): for very large Tc, group the unroll K steps at a time inside
    # lax.fori_loop(..., unroll=True) to bound code size / vreg live ranges.
    for s in range(Tc):
        gates = g_ref[s].astype(jnp.float32) + jnp.dot(
            h.astype(mxu_dtype), wh, preferred_element_type=jnp.float32)

        i_g = jax.nn.sigmoid(gates[:, 0 * H:1 * H])
        f_g = jax.nn.sigmoid(gates[:, 1 * H:2 * H])
        g_g = jnp.tanh(gates[:, 2 * H:3 * H])
        o_g = jax.nn.sigmoid(gates[:, 3 * H:4 * H])

        c_new = f_g * c + i_g * g_g                              # [B, H]

        slot = s % K                                             # static index
        old = d[slot]
        new_sum = s_sum + (c_new - old)                          # O(1) in K
        h_new = o_g * jnp.tanh(new_sum * inv_K)

        # Only the (statically known) tail steps of a padded sequence need a
        # runtime mask; fully-valid steps pay nothing.
        if (total_steps % Tc != 0) and (s >= total_steps % Tc):
            valid = (chunk * Tc + s) < total_steps
            h = jnp.where(valid, h_new, h)
            c = jnp.where(valid, c_new, c)
            d[slot] = jnp.where(valid, c_new, old)
            s_sum = jnp.where(valid, new_sum, s_sum)
        else:
            h, c, d[slot], s_sum = h_new, c_new, c_new, new_sum

        hseq_ref[s] = h.astype(hseq_ref.dtype)

    # Single write-back of the carried state per chunk.
    h_ref[...] = h
    c_ref[...] = c
    for k in range(K):
        d_ref[k] = d[k]


def _pick_time_chunk(T, K, target):
    # Largest multiple of K that is <= target (and not wastefully larger than
    # T rounded up to K); at least K so slot indices stay static.
    tc = (min(target, T + K - 1) // K) * K
    return max(K, tc)


def mlstm_forward(inputs, params, h0, c0, d0, *,
                  hidden_size, K, output_size,
                  time_chunk=15, batch_blocks=1, mxu_dtype=jnp.float32):
    """inputs: [T, B, input_size] -> (outputs [T, B, output_size], (h, c, d))."""
    T, B, I = inputs.shape
    H = hidden_size
    wx, wh, b, wo, bo = params

    assert B % batch_blocks == 0
    Bblk = B // batch_blocks
    # Splitting batch below a sublane tile would force masked stores.
    assert batch_blocks == 1 or Bblk % 8 == 0, "batch blocks should be 8-aligned"

    Tc = _pick_time_chunk(T, K, time_chunk)
    n_chunks = pl.cdiv(T, Tc)
    Tp = n_chunks * Tc

    cdt = jnp.dtype(mxu_dtype)

    # 1) Hoisted input projection + folded bias: one tiled batched MXU matmul.
    pre_gates = _dense(inputs.reshape(T * B, I).astype(cdt), wx.astype(cdt), b, cdt)
    pre_gates = pre_gates.reshape(T, B, 4 * H)
    if Tp != T:
        pre_gates = jnp.pad(pre_gates, ((0, Tp - T), (0, 0), (0, 0)))

    state2 = lambda bb, t: (bb, 0)
    state3 = lambda bb, t: (0, bb, 0)

    grid_spec = pltpu.PrefetchScalarGridSpec(
        num_scalar_prefetch=0,
        grid=(batch_blocks, n_chunks),            # batch parallel (v7x 2 TCs), time sequential
        in_specs=[
            pl.BlockSpec((Tc, Bblk, 4 * H), lambda bb, t: (t, bb, 0)),   # pre-gates chunk
            pl.BlockSpec((Bblk, H), state2),                             # h0
            pl.BlockSpec((Bblk, H), state2),                             # c0
            pl.BlockSpec((K, Bblk, H), state3),                          # d0
            # TODO(synk): on v7x at large H, add pipeline_mode=pl.Buffered(1) here.
            pl.BlockSpec((H, 4 * H), lambda bb, t: (0, 0)),              # Wh (constant block)
        ],
        out_specs=[
            pl.BlockSpec((Tc, Bblk, H), lambda bb, t: (t, bb, 0)),       # hidden sequence
            pl.BlockSpec((Bblk, H), state2),                             # final h
            pl.BlockSpec((Bblk, H), state2),                             # final c
            pl.BlockSpec((K, Bblk, H), state3),                          # final d
        ],
    )

    kernel = functools.partial(_mlstm_recurrent_kernel,
                               K=K, time_chunk=Tc, total_steps=T)

    h_seq, h_f, c_f, d_f = pl.pallas_call(
        kernel,
        grid_spec=grid_spec,
        out_shape=(
            jax.ShapeDtypeStruct((Tp, B, H), cdt),
            jax.ShapeDtypeStruct((B, H), jnp.float32),
            jax.ShapeDtypeStruct((B, H), jnp.float32),
            jax.ShapeDtypeStruct((K, B, H), jnp.float32),
        ),
        compiler_params=pltpu.CompilerParams(
            dimension_semantics=("parallel", "arbitrary"),
            vmem_limit_bytes=_VMEM_LIMIT_BYTES),
    )(pre_gates, h0, c0, d0, wh.astype(cdt))

    # 2) Deferred output projection: one tiled, lane-dense MXU matmul.
    outs = _dense(h_seq[:T].reshape(T * B, H), wo.astype(cdt), bo, inputs.dtype)
    outs = outs.reshape(T, B, output_size)

    return outs, (h_f, c_f, d_f)


# ---------------------------------------------------------------------------
# Pure-JAX reference (lax.scan) of the same cell, for verification.
# ---------------------------------------------------------------------------
def mlstm_reference(inputs, params, h0, c0, d0, *, hidden_size, K):
    wx, wh, b, wo, bo = params
    H = hidden_size

    def step(carry, xt):
        h, c, d, t = carry
        gates = xt @ wx + h @ wh + b
        i_g = jax.nn.sigmoid(gates[:, 0 * H:1 * H])
        f_g = jax.nn.sigmoid(gates[:, 1 * H:2 * H])
        g_g = jnp.tanh(gates[:, 2 * H:3 * H])
        o_g = jax.nn.sigmoid(gates[:, 3 * H:4 * H])
        c_new = f_g * c + i_g * g_g
        d_new = d.at[t % K].set(c_new)
        h_new = o_g * jnp.tanh(jnp.mean(d_new, axis=0))
        y = h_new @ wo + bo
        return (h_new, c_new, d_new, t + 1), y

    (h_f, c_f, d_f, _), ys = jax.lax.scan(step, (h0, c0, d0, 0), inputs)
    return ys, (h_f, c_f, d_f)


if __name__ == "__main__":
    # Small deterministic configuration.  H=128 keeps every gate slice and
    # h/c/hseq store lane-tile aligned (perf-review item).
    T, B = 8, 2
    input_size, hidden_size, K, output_size = 4, 128, 3, 8

    key = jax.random.PRNGKey(0)
    k_x, k_wx, k_wh, k_b, k_wo, k_bo = jax.random.split(key, 6)

    scale = 1.0 / jnp.sqrt(jnp.float32(hidden_size))
    wx = jax.random.uniform(k_wx, (input_size, 4 * hidden_size),
                            jnp.float32, -scale, scale)
    wh = jax.random.uniform(k_wh, (hidden_size, 4 * hidden_size),
                            jnp.float32, -scale, scale)
    b = jax.random.uniform(k_b, (1, 4 * hidden_size), jnp.float32, -scale, scale)
    wo = jax.random.uniform(k_wo, (hidden_size, output_size),
                            jnp.float32, -scale, scale)
    bo = jax.random.uniform(k_bo, (1, output_size), jnp.float32, -scale, scale)
    params = (wx, wh, b, wo, bo)

    inputs = jax.random.normal(k_x, (T, B, input_size), jnp.float32)

    # hx == None path: zero-initialized hidden / cell / multi-scale buffer.
    h0 = jnp.zeros((B, hidden_size), jnp.float32)
    c0 = jnp.zeros((B, hidden_size), jnp.float32)
    d0 = jnp.zeros((K, B, hidden_size), jnp.float32)

    ref_outs, (ref_h, ref_c, ref_d) = mlstm_reference(
        inputs, params, h0, c0, d0, hidden_size=hidden_size, K=K)

    # f32 path: time_chunk=3 -> Tc=3, 3 chunks, last chunk has one masked
    # (padded) step, so cross-chunk state carry AND tail masking are exercised.
    outs, (h_f, c_f, d_f) = mlstm_forward(
        inputs, params, h0, c0, d0,
        hidden_size=hidden_size, K=K, output_size=output_size,
        time_chunk=3, batch_blocks=1, mxu_dtype=jnp.float32)
    jax.block_until_ready(outs)

    # Tolerance covers MXU-vs-XLA f32 matmul precision differences; any logic
    # bug (wrong gate / slot / carry) would be orders of magnitude larger.
    assert jnp.allclose(outs, ref_outs, atol=2e-3, rtol=2e-3)
    assert jnp.allclose(h_f, ref_h, atol=2e-3, rtol=2e-3)
    assert jnp.allclose(c_f, ref_c, atol=2e-3, rtol=2e-3)
    assert jnp.allclose(d_f, ref_d, atol=2e-3, rtol=2e-3)

    # bf16 MXU-operand path (production option from the perf review): weights,
    # pre-gates and hseq in bf16, f32 accumulate + f32 gate math.  Loose
    # sanity tolerance only.
    outs16, (h16, c16, d16) = mlstm_forward(
        inputs, params, h0, c0, d0,
        hidden_size=hidden_size, K=K, output_size=output_size,
        time_chunk=6, batch_blocks=1, mxu_dtype=jnp.bfloat16)
    jax.block_until_ready(outs16)
    assert jnp.allclose(outs16, ref_outs, atol=1e-1, rtol=1e-1)
    assert jnp.allclose(h16, ref_h, atol=1e-1, rtol=1e-1)
    assert jnp.allclose(c16, ref_c, atol=1e-1, rtol=1e-1)

    print("KERNEL_OK")
</pallas_src>

<mosaic_0001>
module attributes {stable_mosaic.version = 11 : i64} {
  func.func @_dense_kernel(%arg0: i32, %arg1: i32, %arg2: i32, %arg3: memref<16x128xf32, #tpu.memory_space<vmem>>, %arg4: memref<128x256xf32, #tpu.memory_space<vmem>>, %arg5: memref<1x256xf32, #tpu.memory_space<vmem>>, %arg6: memref<16x256xf32, #tpu.memory_space<vmem>>, %arg7: memref<16x256xf32, #tpu.memory_space<vmem>>) attributes {dimension_semantics = [#tpu.dimension_semantics<parallel>, #tpu.dimension_semantics<parallel>, #tpu.dimension_semantics<arbitrary>], iteration_bounds = array<i64: 1, 2, 1>, scalar_prefetch = 0 : i64, scratch_operands = 1 : i64, tpu.core_type = #tpu.core_type<tc>, window_params = [{transform_indices = @transform_0, window_bounds = array<i64: 16, 128>}, {transform_indices = @transform_1, window_bounds = array<i64: 128, 256>}, {transform_indices = @transform_2, window_bounds = array<i64: 1, 256>}, {transform_indices = @transform_3, window_bounds = array<i64: 16, 256>}]} {
    %c0_i32 = arith.constant 0 : i32
    %0 = arith.cmpi eq, %arg2, %c0_i32 : i32
    %1 = arith.extui %0 : i1 to i32
    %c0_i32_0 = arith.constant 0 : i32
    %2 = arith.cmpi ne, %1, %c0_i32_0 : i32
    scf.if %2 {
      %cst_10 = arith.constant 0.000000e+00 : f32
      %12 = vector.broadcast %cst_10 : f32 to vector<16x256xf32>
      %c0_11 = arith.constant 0 : index
      %c0_12 = arith.constant 0 : index
      %13 = vector.load %arg7[%c0_11, %c0_12] : memref<16x256xf32, #tpu.memory_space<vmem>>, vector<16x256xf32>
      tpu.vector_store %arg7[%c0_11, %c0_12], %12 {strides = array<i32>} : memref<16x256xf32, #tpu.memory_space<vmem>>, vector<16x256xf32>,
    } else {
    }
    %c0 = arith.constant 0 : index
    %c0_1 = arith.constant 0 : index
    %3 = vector.load %arg7[%c0, %c0_1] : memref<16x256xf32, #tpu.memory_space<vmem>>, vector<16x256xf32>
    %c0_2 = arith.constant 0 : index
    %c0_3 = arith.constant 0 : index
    %4 = vector.load %arg3[%c0_2, %c0_3] : memref<16x128xf32, #tpu.memory_space<vmem>>, vector<16x128xf32>
    %c0_4 = arith.constant 0 : index
    %c0_5 = arith.constant 0 : index
    %5 = vector.load %arg4[%c0_4, %c0_5] : memref<128x256xf32, #tpu.memory_space<vmem>>, vector<128x256xf32>
    %cst = arith.constant dense<0.000000e+00> : vector<16x256xf32>
    %6 = tpu.matmul %4, %5, %cst {dimension_numbers = #tpu.dot_dimension_numbers<[1], [0], [0], [1], [0, 0, 1, 1], [], []>} : vector<16x128xf32>, vector<128x256xf32>, vector<16x256xf32> -> vector<16x256xf32>
    %7 = arith.addf %3, %6 : vector<16x256xf32>
    %c0_6 = arith.constant 0 : index
    %c0_7 = arith.constant 0 : index
    %8 = vector.load %arg7[%c0_6, %c0_7] : memref<16x256xf32, #tpu.memory_space<vmem>>, vector<16x256xf32>
    tpu.vector_store %arg7[%c0_6, %c0_7], %7 {strides = array<i32>} : memref<16x256xf32, #tpu.memory_space<vmem>>, vector<16x256xf32>,
    %c0_i32_8 = arith.constant 0 : i32
    %9 = arith.cmpi eq, %arg2, %c0_i32_8 : i32
    %10 = arith.extui %9 : i1 to i32
    %c0_i32_9 = arith.constant 0 : i32
    %11 = arith.cmpi ne, %10, %c0_i32_9 : i32
    scf.if %11 {
      %c0_10 = arith.constant 0 : index
      %c0_11 = arith.constant 0 : index
      %12 = vector.load %arg7[%c0_10, %c0_11] : memref<16x256xf32, #tpu.memory_space<vmem>>, vector<16x256xf32>
      %c0_12 = arith.constant 0 : index
      %c0_13 = arith.constant 0 : index
      %13 = vector.load %arg5[%c0_12, %c0_13] : memref<1x256xf32, #tpu.memory_space<vmem>>, vector<1x256xf32>
      %14 = vector.broadcast %13 : vector<1x256xf32> to vector<16x256xf32>
      %15 = arith.addf %12, %14 : vector<16x256xf32>
      %c0_14 = arith.constant 0 : index
      %c0_15 = arith.constant 0 : index
      %16 = vector.load %arg6[%c0_14, %c0_15] : memref<16x256xf32, #tpu.memory_space<vmem>>, vector<16x256xf32>
      tpu.vector_store %arg6[%c0_14, %c0_15], %15 {strides = array<i32>} : memref<16x256xf32, #tpu.memory_space<vmem>>, vector<16x256xf32>,
    } else {
    }
    return
  }
  func.func @transform_0(%arg0: i32, %arg1: i32, %arg2: i32) -> (i32, i32) {
    %c0_i32 = arith.constant 0 : i32
    return %arg0, %arg2 : i32, i32
  }
  func.func @transform_1(%arg0: i32, %arg1: i32, %arg2: i32) -> (i32, i32) {
    %c0_i32 = arith.constant 0 : i32
    return %arg2, %arg1 : i32, i32
  }
  func.func @transform_2(%arg0: i32, %arg1: i32, %arg2: i32) -> (i32, i32) {
    %c0_i32 = arith.constant 0 : i32
    %c0_i32_0 = arith.constant 0 : i32
    return %c0_i32, %arg1 : i32, i32
  }
  func.func @transform_3(%arg0: i32, %arg1: i32, %arg2: i32) -> (i32, i32) {
    %c0_i32 = arith.constant 0 : i32
    return %arg0, %arg1 : i32, i32
  }
}

</mosaic_0001>

<bundles_post_ra>
// kernel: tpu_custom_call.1
= control target key start
LH: loop header
LB: loop body
LE: loop exit
PB: predicated region body
PF: predicated region fallthrough
CT: control target
= control target key end

     0   :  { %8 = vsyncpa [#allocation4], 0  ;;  %s1142_s0 = inlined_call_operand.hbm [shape: f32[16,128], index: 0, kind: input, shape index: {}]   ;;  %s1143_s1 = inlined_call_operand.hbm [shape: f32[128,512], index: 1, kind: input, shape index: {}]   ;;  %s1144_s2 = inlined_call_operand.vmem [shape: f32[1,512], index: 2, kind: input, shape index: {}]   ;;  %s1145_s3 = inlined_call_operand.hbm [shape: f32[16,512], index: 3, kind: output, shape index: {}]  }
   0x1   :  { %9 = vsyncpa [#allocation7], 0 }
   0x2   :  { %11 = vsyncpa [#allocation7 + $0x1], 0 }
   0x3   :  { %12 = vsyncpa [#allocation5], 0 }
   0x4   :  { %14 = vsyncpa [#allocation5 + $0x1], 0  ;;  %s883_s12 = smov 0   ;;  %s885_s13 = smov 0  }
   0x5   :  { %s887_s14 = smov 0   ;;  %s889_s15 = smov 0  }
   0x6   :  { %s891_s16 = smov 0   ;;  %s893_s17 = smov 0  }
   0x7 LB: > { %s555_s18 = sadd.s32 4294967295, %s849_s17   ;;  %s556_s19 = sadd.s32 4294967294, %s849_s17   ;;  %s849_s17 = sphi %s893_s17, %s20_s17   ;;  %s845_s16 = sphi %s891_s16, %s1171_s16   ;;  %s841_s15 = sphi %s889_s15, %s1170_s15   ;;  %s837_s14 = sphi %s887_s14, %s1169_s14   ;;  %s833_s13 = sphi %s885_s13, %s1168_s13   ;;  %s829_s12 = sphi %s883_s12, %s1167_s12  }
   0x8   : > { %p83_p0 = scmp.ne.s32.totalorder %s837_s14, %s833_s13  ;;  %p84_p1 = scmp.eq.s32.totalorder %s849_s17, 0 }
   0x9   : > { %p89_p2 = scmp.ne.s32.totalorder %s833_s13, %s829_s12  ;;  %p920_p3 = scmp.eq.s32.totalorder %s555_s18, 0 }
   0xa   : > { %p924_p4 = por %p84_p1, %p83_p0  ;;  %p141_p5 = scmp.eq.s32.totalorder %s555_s18, 1 }
   0xb   : > { %s1152_s20 = scalar_select %p920_p3, 1, 0 }
   0xc   : > { %p930_p6 = por %p920_p3, %p89_p2  ;;  %p147_p7 = scmp.eq.s32.totalorder %s556_s19, 1 }
   0xd   : > { %p934_p8 = por %p141_p5, %p83_p0  ;;  %p557_p9 = scmp.ge.s32.totalorder %s849_s17, 1 }
   0xe   : > { %s1154_s22 = scalar_select %p930_p6, 1, 0 }
   0xf   : > { %s1155_s23 = scalar_select %p934_p8, 1, 0 }
  0x10   : > { %p939_p10 = por %p147_p7, %p89_p2  ;;  %p154_p11 = scmp.lt.s32.totalorder %s849_s17, 3 }
  0x11   : > { %s851_s26 = smov [#allocation3]   ;;  %p644_p1 = scmp.lt.s32.totalorder %s849_s17, 2 }
  0x12   : > { %s1156_s24 = scalar_select %p939_p10, 1, 0 }
  0x13   : > { %p944_p12 = pnand %p557_p9, %p154_p11  ;;  %s170_s27 = sshll.u32 %s851_s26, 4  ;;  %s948_s27 = int_to_ptr.vmem [resolvable:$true] %s170_s27 }
  0x14   : > { %p962_p2 = pnand %p644_p1, %p924_p4  ;;  %s35_s30 = sadd.s32 1, %s845_s16 }
  0x15   : > { %s1157_s25 = scalar_select %p944_p12, 1, 0 }
  0x16   : > { %p631_p13 = pneg %p944_p12  ;;  %s705_s6 = scalar_lea.hbm %s1142_s0, 256 }
  0x17   : > { %s1159_s29 = scalar_select %p962_p2, 1, 0 }
  0x18   : > { %p956_p5 = pnand %p631_p13, %p920_p3  ;;  %p706_p7 = scmp.ne.s32.totalorder %s1142_s0, %s705_s6 }
  0x19   : > { %p712_p4 = scmp.lt.u32.totalorder %s705_s6, %s1142_s0 }
  0x1a   : > { %p707_p9 = pneg %p956_p5 }
  0x1c   : > { %p708_p11 = pnand %p707_p9, %p706_p7 }
  0x1e   : > { %p709_p13 = pneg %p708_p11 }
  0x20   : > { %p714_p1 = pnand %p712_p4, %p709_p13 }
  0x22   : > { %717 = shalt.err (!%p714_p1)
}
  0x23   : > { %s718_s11 = scalar_lea.vmem %s948_s27, 256  ;;  %p726_p6 = scmp.lt.s32.totalorder %s948_s27, %s948_s27 }
  0x24   : > { %p719_p0 = scmp.ne.s32.totalorder %s948_s27, %s718_s11  ;;  %p727_p3 = scmp.lt.s32.totalorder %s718_s11, %s718_s11 }
  0x26   : > { %p721_p10 = pnand %p719_p0, %p707_p9  ;;  %p728_p12 = por %p727_p3, %p726_p6 }
  0x28   : > { %p722_p8 = pneg %p721_p10 }
  0x2a   : > { %p729_p2 = pnand %p728_p12, %p722_p8 }
  0x2c   : > { %732 = shalt.err (!%p729_p2)
}
  0x2d   : > { %s852_s18 = smov 128   ;;  %s853_s19 = smov 8  }
  0x2e   : > { %634 = dma.hbm_to_vmem [thread:$0]  (!%p956_p5), %s1142_s0, 256, %s948_s27, [#allocation4], %s852_s18, %s852_s18, %s853_s19  }
  0x2f   : > { %p37_p10 = scmp.ge.s32.totalorder %s35_s30, 2  ;;  %s76_s4 = sadd.s32 1, %s837_s14 }
  0x30   : > { %s184_s5 = sand.u32 1, %s837_s14   ;;  %s573_s8 = sshll.u32 %s845_s16, 8 }
  0x31   : > { %s1173_s30 = smov (%p37_p10, %s35_s30), 0  ;;  %s560_s6 = sshll.u32 %s184_s5, 8 }
  0x32   : > { %s72_s7 = ssub.s32 %s845_s16, %s1173_s30  ;;  %s998_s28 = scalar_lea.hbm %s1143_s1, %s573_s8 }
  0x33   : > { %p74_p3 = scmp.eq.s32.totalorder %s72_s7, 0  ;;  %s188_s27 = scalar_lea.vmem [#allocation6], %s560_s6 }
  0x34   : > { %s198_s11 = sshll.u32 %s188_s27, 4  ;;  %s1005_s19 = scalar_lea.sflag [#allocation7], %s184_s5  ;;  %s1003_s11 = int_to_ptr.vmem [resolvable:$true] %s198_s11 }
  0x35   : > { %s1001_s18 = scalar_select %p74_p3, %s837_s14, %s76_s4  }
  0x36   : > { %s733_s21 = scalar_lea.hbm %s998_s28, 4096  ;;  %p1160_p8 = scmp.ne.s32.totalorder %s1159_s29, 0 }
  0x37   : > { %p734_p6 = scmp.ne.s32.totalorder %s998_s28, %s733_s21  ;;  %s738_s8 = scalar_lea.hbm %s1143_s1, 8192 }
  0x38   : > { %p735_p12 = pneg %p1160_p8  ;;  %p739_p2 = scmp.lt.u32.totalorder %s998_s28, %s1143_s1 }
  0x39   : > { %p740_p7 = scmp.lt.u32.totalorder %s738_s8, %s733_s21  ;;  %p742_p11 = scmp.lt.u32.totalorder %s733_s21, %s998_s28 }
  0x3a   : > { %p736_p0 = pnand %p735_p12, %p734_p6 }
  0x3b   : > { %p741_p9 = por %p740_p7, %p739_p2 }
  0x3c   : > { %p737_p5 = pneg %p736_p0 }
  0x3d   : > { %p743_p13 = por %p742_p11, %p741_p9 }
  0x3f   : > { %p744_p4 = pnand %p743_p13, %p737_p5 }
  0x41   : > { %747 = shalt.err (!%p744_p4)
}
  0x42   : > { %s748_s4 = scalar_lea.vmem %s1003_s11, 4096  ;;  %s854_s5 = smov [#allocation6]  }
  0x43   : > { %p749_p1 = scmp.ne.s32.totalorder %s1003_s11, %s748_s4  ;;  %s753_s10 = sshll.u32 %s854_s5, 4  ;;  %s754_s10 = int_to_ptr.vmem [resolvable:$false] %s753_s10 }
  0x44   : > { %s755_s27 = scalar_lea.vmem %s754_s10, 8192  ;;  %p756_p6 = scmp.lt.s32.totalorder %s1003_s11, %s754_s10 }
  0x45   : > { %p751_p10 = pnand %p749_p1, %p735_p12  ;;  %p757_p0 = scmp.lt.s32.totalorder %s755_s27, %s748_s4 }
  0x47   : > { %p752_p3 = pneg %p751_p10  ;;  %p758_p2 = por %p757_p0, %p756_p6 }
  0x49   : > { %p759_p7 = pnand %p758_p2, %p752_p3 }
  0x4b   : > { %762 = shalt.err (!%p759_p7)
}
  0x4c   : > { %s855_s21 = smov 512   ;;  %s856_s26 = smov 256  }
  0x4d   : > { %s857_s7 = smov 16   ;;  %p1161_p12 = scmp.ne.s32.totalorder %s1157_s25, 0 }
  0x4e   : > { %638 = dma.hbm_to_vmem [thread:$0]  (!%p1160_p8), %s998_s28, 4096, %s1003_s11, %s1005_s19, %s855_s21, %s856_s26, %s857_s7  }
  0x4f   : > { %218 = sbr.rel (%p1161_p12) target bundleno = 357 (0x165), region = 32  ;;  %p1162_p5 = scmp.ne.s32.totalorder (!%p1161_p12), %s1152_s20, 0 }
  0x56   : > { %816 = dma.done.wait (%p1162_p5), [#allocation4], 256  }
  0x57   : > { %818 = vsyncadd (%p1162_p5), [#allocation4], 4294967040  ;;  %s1040_s8 = sand.u32 1, %s833_s13   ;;  %p1163_p8 = scmp.ne.s32.totalorder %s1154_s22, 0 }
  0x58   : > { %s565_s6 = sshll.u32 %s1040_s8, 8  ;;  %s225_s9 = scalar_lea.sflag [#allocation7], %s1040_s8 }
  0x59   : > { %s1044_s4 = scalar_lea.vmem [#allocation6], %s565_s6 }
  0x5a   : > { %820 = dma.done.wait (%p1163_p8), %s225_s9, 4096  }
  0x5b   : > { %822 = vsyncadd (%p1163_p8), %s225_s9, 4294963200  ;;  %v858_v0 = vmov 0.0   ;;  %v280_v1 = vld [vmem:[%s1044_s4 + $0x8] sm:$0xff]  ;;  %v282_v2 = vld [vmem:[%s1044_s4 + $0x18] sm:$0xff]  ;;  %s567_s20 = sshll.u32 %s841_s15, 1  ;;  %v405_v51 = vlaneseq  ;;  %s566_s22 = sshll.u32 %s1040_s8, 5 }
  0x5c   : > { %375 = vmatprep.mubr.f32.mxu0 %v858_v0  ;;  %381 = vmatprep.mubr.f32.mxu1 %v858_v0  ;;  %v279_v3 = vld [vmem:[%s1044_s4] sm:$0xff]  ;;  %v575_v4 = vpack.c.bf16 %v282_v2, %v280_v1  ;;  %v281_v5 = vld [vmem:[%s1044_s4 + $0x10] sm:$0xff]  ;;  %v284_v6 = vld [vmem:[%s1044_s4 + $0x28] sm:$0xff]  ;;  %p259_p9 = scmp.lt.s32.totalorder %s567_s20, 3  ;;  %s254_s11 = scalar_lea.vmem [#allocation8], %s566_s22 }
  0x5d   : > { %v286_v7 = vld [vmem:[%s1044_s4 + $0x38] sm:$0xff]  ;;  %v577_v8 = vpack.c.bf16 %v281_v5, %v279_v3  ;;  %v283_v10 = vld [vmem:[%s1044_s4 + $0x20] sm:$0xff]  ;;  %v285_v11 = vld [vmem:[%s1044_s4 + $0x30] sm:$0xff]  ;;  %v406_v52 = vshrl.u32 %v405_v51, 7  ;;  %s440_s19 = sshll.u32 %s254_s11, 4  ;;  %s574_s5 = sshll.u32 %s841_s15, 8  ;;  %s1088_s19 = int_to_ptr.vmem [resolvable:$true] %s440_s19 }
  0x5e   : > { %v579_v9 = vpack.c.bf16 %v286_v7, %v284_v6  ;;  %v288_v12 = vld [vmem:[%s1044_s4 + $0x48] sm:$0xff]  ;;  %576 = vmatprep.subr.bf16.mxu0 %v575_v4  ;;  %607 = vmatprep.subr.bf16.mxu1 %v575_v4  ;;  %v290_v13 = vld [vmem:[%s1044_s4 + $0x58] sm:$0xff]  ;;  %v581_v14 = vpack.c.bf16 %v285_v11, %v283_v10  ;;  %v287_v16 = vld [vmem:[%s1044_s4 + $0x40] sm:$0xff]  ;;  %s1175_s20 = smov (!%p259_p9, %s567_s20), 3  ;;  %s1093_s21 = scalar_lea.hbm %s1145_s3, %s574_s5 }
  0x5f   : > { %578 = vmatpush1.bf16.msra.mxu0 %v577_v8  ;;  %615 = vmatpush1.bf16.msra.mxu1 %v577_v8  ;;  %v583_v15 = vpack.c.bf16 %v290_v13, %v288_v12  ;;  %v289_v17 = vld [vmem:[%s1044_s4 + $0x50] sm:$0xff]  ;;  %v292_v18 = vld [vmem:[%s1044_s4 + $0x68] sm:$0xff]  ;;  %v294_v19 = vld [vmem:[%s1044_s4 + $0x78] sm:$0xff]  ;;  %s261_s28 = scalar_lea.vmem %s1144_s2, %s1175_s20  ;;  %v407_v53 = vsub.s32 0, %v406_v52  ;;  %v411_v55 = vsub.s32 1, %v406_v52  ;;  %s424_s15 = scalar_lea.sflag [#allocation5], %s1040_s8 }
  0x60   : > { %580 = vmatprep.subr.bf16.mxu0 %v579_v9  ;;  %608 = vmatprep.subr.bf16.mxu1 %v579_v9  ;;  %v585_v20 = vpack.c.bf16 %v289_v17, %v287_v16  ;;  %v587_v21 = vpack.c.bf16 %v294_v19, %v292_v18  ;;  %v291_v22 = vld [vmem:[%s1044_s4 + $0x60] sm:$0xff]  ;;  %v293_v23 = vld [vmem:[%s1044_s4 + $0x70] sm:$0xff]  ;;  %v296_v24 = vld [vmem:[%s1044_s4 + $0x88] sm:$0xff]  ;;  %s763_s26 = scalar_lea.vmem %s1088_s19, 512  ;;  %p1164_p13 = scmp.ne.s32.totalorder %s1155_s23, 0 }
  0x61   : > { %v298_v25 = vld [vmem:[%s1044_s4 + $0x98] sm:$0xff]  ;;  %v589_v26 = vpack.c.bf16 %v293_v23, %v291_v22  ;;  %v295_v28 = vld [vmem:[%s1044_s4 + $0x80] sm:$0xff]  ;;  %v297_v29 = vld [vmem:[%s1044_s4 + $0x90] sm:$0xff]  ;;  %p764_p11 = scmp.ne.s32.totalorder %s1088_s19, %s763_s26  ;;  %s859_s7 = smov [#allocation8]  }
  0x62   : > { %v591_v27 = vpack.c.bf16 %v298_v25, %v296_v24  ;;  %v300_v30 = vld [vmem:[%s1044_s4 + $0xa8] sm:$0xff]  ;;  %v302_v31 = vld [vmem:[%s1044_s4 + $0xb8] sm:$0xff]  ;;  %v593_v32 = vpack.c.bf16 %v297_v29, %v295_v28  ;;  %v299_v34 = vld [vmem:[%s1044_s4 + $0xa0] sm:$0xff]  ;;  %s767_s6 = sshll.u32 %s859_s7, 4  ;;  %s768_s6 = int_to_ptr.vmem [resolvable:$false] %s767_s6 }
  0x63   : > { %582 = vmatpush1.bf16.msra.mxu0 %v581_v14  ;;  %616 = vmatpush1.bf16.msra.mxu1 %v581_v14  ;;  %v595_v33 = vpack.c.bf16 %v302_v31, %v300_v30  ;;  %v301_v35 = vld [vmem:[%s1044_s4 + $0xb0] sm:$0xff]  ;;  %v304_v36 = vld [vmem:[%s1044_s4 + $0xc8] sm:$0xff]  ;;  %v306_v37 = vld [vmem:[%s1044_s4 + $0xd8] sm:$0xff]  ;;  %p765_p4 = pnand %p764_p11, %p1164_p13  ;;  %s769_s9 = scalar_lea.vmem %s768_s6, 1024 }
  0x64   : > { %584 = vmatprep.subr.bf16.mxu0 %v583_v15  ;;  %609 = vmatprep.subr.bf16.mxu1 %v583_v15  ;;  %v597_v38 = vpack.c.bf16 %v301_v35, %v299_v34  ;;  %v599_v39 = vpack.c.bf16 %v306_v37, %v304_v36  ;;  %v303_v40 = vld [vmem:[%s1044_s4 + $0xc0] sm:$0xff]  ;;  %v305_v41 = vld [vmem:[%s1044_s4 + $0xd0] sm:$0xff]  ;;  %v308_v42 = vld [vmem:[%s1044_s4 + $0xe8] sm:$0xff]  ;;  %p770_p10 = scmp.lt.s32.totalorder %s1088_s19, %s768_s6  ;;  %p771_p3 = scmp.lt.s32.totalorder %s769_s9, %s763_s26 }
  0x65   : > { %v310_v43 = vld [vmem:[%s1044_s4 + $0xf8] sm:$0xff]  ;;  %v601_v44 = vpack.c.bf16 %v305_v41, %v303_v40  ;;  %v307_v46 = vld [vmem:[%s1044_s4 + $0xe0] sm:$0xff]  ;;  %v309_v47 = vld [vmem:[%s1044_s4 + $0xf0] sm:$0xff]  ;;  %p766_p1 = pneg %p765_p4 }
  0x66   : > { %v603_v45 = vpack.c.bf16 %v310_v43, %v308_v42  ;;  %v605_v48 = vpack.c.bf16 %v309_v47, %v307_v46  ;;  %v277_v49 = vld [vmem:[#allocation3] sm:$0xff]  ;;  %v278_v50 = vld [vmem:[#allocation3 + $0x8] sm:$0xff]  ;;  %p772_p6 = por %p771_p3, %p770_p10 }
  0x67   : > { %586 = vmatpush1.bf16.msra.mxu0 %v585_v20  ;;  %617 = vmatpush1.bf16.msra.mxu1 %v585_v20  ;;  %v403_v54 = vld [vmem:[%s261_s28] sm:$0x3] }
  0x68   : > { %588 = vmatprep.subr.bf16.mxu0 %v587_v21  ;;  %610 = vmatprep.subr.bf16.mxu1 %v587_v21  ;;  %v408_v56 = vrot.slane %v403_v54, %v407_v53  ;;  %v412_v57 = vrot.slane %v403_v54, %v411_v55  ;;  %p773_p0 = pnand %p772_p6, %p766_p1 }
  0x6b   : > { %590 = vmatpush1.bf16.msra.mxu0 %v589_v26  ;;  %618 = vmatpush1.bf16.msra.mxu1 %v589_v26 }
  0x6c   : > { %592 = vmatprep.subr.bf16.mxu0 %v591_v27  ;;  %611 = vmatprep.subr.bf16.mxu1 %v591_v27 }
  0x6f   : > { %594 = vmatpush1.bf16.msra.mxu0 %v593_v32  ;;  %619 = vmatpush1.bf16.msra.mxu1 %v593_v32 }
  0x70   : > { %596 = vmatprep.subr.bf16.mxu0 %v595_v33  ;;  %612 = vmatprep.subr.bf16.mxu1 %v595_v33 }
  0x73   : > { %598 = vmatpush1.bf16.msra.mxu0 %v597_v38  ;;  %620 = vmatpush1.bf16.msra.mxu1 %v597_v38 }
  0x74   : > { %600 = vmatprep.subr.bf16.mxu0 %v599_v39  ;;  %613 = vmatprep.subr.bf16.mxu1 %v599_v39 }
  0x77   : > { %602 = vmatpush1.bf16.msra.mxu0 %v601_v44  ;;  %621 = vmatpush1.bf16.msra.mxu1 %v601_v44 }
  0x78   : > { %604 = vmatprep.subr.bf16.mxu0 %v603_v45  ;;  %614 = vmatprep.subr.bf16.mxu1 %v603_v45 }
  0x7b   : > { %606 = vmatpush1.bf16.msra.mxu0 %v605_v48  ;;  %622 = vmatpush1.bf16.msra.mxu1 %v605_v48 }
  0x7e   : > { %376 = vmatmul.mubr.f32.vlgmr.msra.gmra.mrb[0].mxu0 %v277_v49  ;;  %382 = vmatmul.mubr.f32.vlgmr.msra.gmra.mrb[0].mxu1 %v278_v50 }
 0x151   : > { %v377_v58 = vpop.f32.mrb[0].mxu0  ;;  %v383_v59 = vpop.f32.mrb[0].mxu1 }
 0x152   : > { %v415_v60 = vadd.f32 %v408_v56, %v377_v58  ;;  %v417_v61 = vadd.f32 %v408_v56, %v383_v59  ;;  %v379_v62 = vpop.f32.mrb[1].mxu0  ;;  %v385_v63 = vpop.f32.mrb[1].mxu1 }
 0x153   : > { %v416_v0 = vadd.f32 %v412_v57, %v379_v62  ;;  %v418_v1 = vadd.f32 %v412_v57, %v385_v63 }
 0x154   : > { %419 = vst [vmem:[%s254_s11] sm:$0xff] %v415_v60  ;;  %421 = vst [vmem:[%s254_s11 + $0x10] sm:$0xff] %v417_v61 }
 0x155   : > { %420 = vst [vmem:[%s254_s11 + $0x8] sm:$0xff] %v416_v0  ;;  %422 = vst [vmem:[%s254_s11 + $0x18] sm:$0xff] %v418_v1 }
 0x156   : > { %776 = shalt.err (!%p773_p0)
}
 0x157   : > { %s777_s4 = scalar_lea.hbm %s1093_s21, 512  ;;  %s781_s25 = scalar_lea.hbm %s1145_s3, 1024 }
 0x158   : > { %p778_p2 = scmp.ne.s32.totalorder %s1093_s21, %s777_s4  ;;  %p782_p5 = scmp.lt.u32.totalorder %s1093_s21, %s1145_s3 }
 0x159   : > { %p783_p8 = scmp.lt.u32.totalorder %s781_s25, %s777_s4  ;;  %p785_p11 = scmp.lt.u32.totalorder %s777_s4, %s1093_s21 }
 0x15a   : > { %p779_p7 = pnand %p778_p2, %p1164_p13 }
 0x15b   : > { %p784_p9 = por %p783_p8, %p782_p5 }
 0x15c   : > { %p780_p12 = pneg %p779_p7 }
 0x15d   : > { %p786_p4 = por %p785_p11, %p784_p9 }
 0x15f   : > { %p787_p1 = pnand %p786_p4, %p780_p12 }
 0x161   : > { %790 = shalt.err (!%p787_p1)
}
 0x162   : > { %s860_s11 = smov 256   ;;  %s861_s5 = smov 512  }
 0x163   : > { %s862_s10 = smov 16  }
 0x164   : > { %629 = dma.vmem_to_hbm [thread:$0]  (%p1164_p13), %s1088_s19, 512, %s1093_s21, %s424_s15, %s860_s11, %s861_s5, %s862_s10  }
 0x165 PF: > { %s455_s27 = sand.u32 1, %s829_s12   ;;  %p1165_p10 = scmp.ne.s32.totalorder %s1156_s24, 0 }
 0x166   : > { %p1166_p3 = scmp.ge.s32.totalorder %s849_s17, 2  ;;  %s456_s26 = scalar_lea.sflag [#allocation5], %s455_s27 }
 0x168   : > { %p640_p6 = pnand %p1166_p3, %p1165_p10 }
 0x16a   : > { %824 = dma.done.wait (!%p640_p6), %s456_s26, 512  }
 0x16b   : > { %826 = vsyncadd (!%p640_p6), %s456_s26, 4294966784  ;;  %s20_s17 = sadd.s32 1, %s849_s17   ;;  %s1167_s12 = smov %s833_s13 }
 0x16c   : > { %p17_p0 = scmp.ge.s32.totalorder %s20_s17, 4   ;;  %s1168_s13 = smov %s837_s14 }
 0x16d   : > { %s1169_s14 = smov %s1001_s18  ;;  %s1170_s15 = smov %s845_s16 }
 0x16e   : > { %s1171_s16 = smov %s1173_s30  ;;  %19 = sbr.rel (!%p17_p0) target bundleno = 7 (0x7), region = 94 }
 0x175   :  { %461 = vsyncpa [#allocation4], 1 }
 0x176   :  { %463 = vsyncpa [#allocation4 + $0x1], 1 }
 0x177   :  { %464 = vsyncpa [#allocation7], 1 }
 0x178   :  { %466 = vsyncpa [#allocation7 + $0x1], 1 }
 0x179   :  { %467 = vsyncpa [#allocation5], 1 }
 0x17a   :  { %469 = vsyncpa [#allocation5 + $0x1], 1 }

</bundles_post_ra>
